<compile_context>
chip_gen: v7x
topology: tpu7x:2x2x1
jax: 0.10.0
libtpu: 0.0.40
codegen_flags: <defaults>
</compile_context>

<pallas_src>
import jax
import jax.numpy as jnp
from jax.experimental import pallas as pl
from jax.experimental.pallas import tpu as pltpu

INPUT_DIM = 5
HIDDEN_DIM = 64
HIDDEN2_DIM = HIDDEN_DIM // 2
OUTPUT_DIM = 1
LN_EPS = 1e-5

MIN_TILE_B = 2048   # keep tiles large enough to amortize the ~0.35us/step overhead
MAX_TILE_B = 8192   # per-tile VMEM ~<20 MiB -> comfortably under the limit below
VMEM_LIMIT_BYTES = 48 * 1024 * 1024   # > v5e's 16 MiB default, < v7x's 64 MiB physical


def _round_up(n, m):
    return (n + m - 1) // m * m


def _choose_tile_b(batch):
    """Batch tile (lanes).  >= 2 tiles for v7x's two TensorCores whenever tiles
    can stay >= MIN_TILE_B; otherwise one (at most MAX_TILE_B-wide) tile."""
    two_way = _round_up(-(-batch // 2), 128)
    tile = max(MIN_TILE_B, two_way)
    return min(tile, MAX_TILE_B, _round_up(batch, 128))


def _layernorm_t(h, gamma, beta):
    """LayerNorm over the feature axis (axis 0) of a (features, batch) tile.

    Single-pass statistics: sum(h) and sum(h*h) are independent reductions
    (no mean -> center -> reduce chain); var = E[h^2] - mean^2, clamped at 0
    to guard the tiny-negative cancellation case."""
    inv_n = 1.0 / h.shape[0]
    mean = jnp.sum(h, axis=0, keepdims=True) * inv_n
    mean_sq = jnp.sum(h * h, axis=0, keepdims=True) * inv_n
    var = jnp.maximum(mean_sq - mean * mean, 0.0)
    inv = jax.lax.rsqrt(var + LN_EPS)
    return (h - mean) * inv * gamma + beta


def mlp_kernel(x_ref,
               w1_ref, b1_ref, g1_ref, be1_ref,
               w2_ref, b2_ref, g2_ref, be2_ref,
               w3_ref, b3_ref,
               o_ref):
    # Natural-layout input block: (TILE_B, INPUT_DIM).
    x = x_ref[...]

    # Layer 1: Linear(5 -> 64) + LayerNorm(64) + ReLU.
    # Contract both size-5 axes -> h1^T of shape (64, TILE_B); no x^T is ever
    # materialized in HBM, and internals stay feature-on-sublane / batch-on-lane.
    h1 = jax.lax.dot_general(
        w1_ref[...], x, (((1,), (1,)), ((), ())),
        preferred_element_type=jnp.float32) + b1_ref[...]
    h1 = jnp.maximum(_layernorm_t(h1, g1_ref[...], be1_ref[...]), 0.0)

    # Layer 2: Linear(64 -> 32) + LayerNorm(32) + ReLU.
    # TODO(synk): bf16 MXU-operand cast (v6e/v7x) intentionally skipped to keep
    # exact f32 fidelity vs the PyTorch reference; the MXU is not the binding slot.
    h2 = jnp.dot(w2_ref[...], h1, preferred_element_type=jnp.float32) + b2_ref[...]
    h2 = jnp.maximum(_layernorm_t(h2, g2_ref[...], be2_ref[...]), 0.0)

    # Layer 3: Linear(32 -> 1) as VPU broadcast-multiply + sublane reduce
    # (avoids a 1/128-utilized MXU matmul; result is a lane-dense (1, TILE_B)
    # row for an unmasked store).
    out = jnp.sum(h2 * w3_ref[...], axis=0, keepdims=True) + b3_ref[...]
    o_ref[...] = jax.nn.sigmoid(out).astype(o_ref.dtype)


def _param_spec(arr):
    # Full-array block with a constant index map (DMA'd once across the grid).
    # Shape is bound eagerly (avoids the late-binding-lambda hazard).
    return pl.BlockSpec(arr.shape, lambda i: (0, 0))


@jax.jit
def mlp_forward(x, params):
    """x: (B, 5) float32 -> (B, 1) float32."""
    B = x.shape[0]
    tile_b = _choose_tile_b(B)
    num_tiles = pl.cdiv(B, tile_b)
    b_out = num_tiles * tile_b     # padded output width: every store is lane-dense

    x = x.astype(jnp.float32)

    args = (x,
            params["w1"], params["b1"], params["g1"], params["be1"],
            params["w2"], params["b2"], params["g2"], params["be2"],
            params["w3"], params["b3"])

    # Natural (TILE_B, 5) input blocks: last block dim equals the full array
    # dim (legal), batch dim is a multiple of 8/128.  The ragged last block is
    # masked by Pallas; its garbage columns are column-isolated and sliced off.
    in_specs = [pl.BlockSpec((tile_b, INPUT_DIM), lambda i: (i, 0))]
    in_specs += [_param_spec(a) for a in args[1:]]
    out_spec = pl.BlockSpec((1, tile_b), lambda i: (0, i))

    # Advisory cost estimate: input/output counted once, params counted once
    # (constant index maps -> single DMA), no transpose/pad traffic.
    flops = 2 * B * (INPUT_DIM * HIDDEN_DIM
                     + HIDDEN_DIM * HIDDEN2_DIM
                     + HIDDEN2_DIM) \
            + 10 * B * (HIDDEN_DIM + HIDDEN2_DIM)      # LN/ReLU vector work
    param_bytes = sum(int(a.size) * a.dtype.itemsize for a in args[1:])
    bytes_accessed = B * INPUT_DIM * 4 + b_out * 4 + param_bytes
    cost = pl.CostEstimate(flops=int(flops),
                           transcendentals=int(3 * B),   # 2x rsqrt + sigmoid
                           bytes_accessed=int(bytes_accessed))

    out = pl.pallas_call(
        mlp_kernel,
        out_shape=jax.ShapeDtypeStruct((1, b_out), jnp.float32),
        grid=(num_tiles,),
        in_specs=in_specs,
        out_specs=out_spec,
        compiler_params=pltpu.CompilerParams(
            dimension_semantics=("parallel",),       # megacore split on v7x
            vmem_limit_bytes=VMEM_LIMIT_BYTES),
        cost_estimate=cost,
    )(*args)

    # (1, b_out) -> (B, 1); layout-compatible slice+reshape, negligible traffic.
    return out[0, :B].reshape(B, OUTPUT_DIM)


def init_params(key):
    """PyTorch-default-style init.  Linear weights kept in PyTorch (out, in)
    layout; biases / LN params stored as (out, 1) columns for the transposed
    (feature, batch) kernel internals."""
    ks = jax.random.split(key, 6)

    def linear(kw, kb, fan_in, fan_out):
        bound = 1.0 / jnp.sqrt(fan_in)
        w = jax.random.uniform(kw, (fan_out, fan_in), jnp.float32, -bound, bound)
        b = jax.random.uniform(kb, (fan_out, 1), jnp.float32, -bound, bound)
        return w, b

    w1, b1 = linear(ks[0], ks[1], INPUT_DIM, HIDDEN_DIM)
    w2, b2 = linear(ks[2], ks[3], HIDDEN_DIM, HIDDEN2_DIM)
    w3, b3 = linear(ks[4], ks[5], HIDDEN2_DIM, OUTPUT_DIM)

    return {
        "w1": w1, "b1": b1,
        "g1": jnp.ones((HIDDEN_DIM, 1), jnp.float32),
        "be1": jnp.zeros((HIDDEN_DIM, 1), jnp.float32),
        "w2": w2, "b2": b2,
        "g2": jnp.ones((HIDDEN2_DIM, 1), jnp.float32),
        "be2": jnp.zeros((HIDDEN2_DIM, 1), jnp.float32),
        "w3": jnp.transpose(w3),   # (32, 1) column for sublane broadcast
        "b3": b3,                  # (1, 1)
    }


def mlp_reference(x, p):
    """Plain-JAX reference matching the PyTorch forward (row-major layout,
    two-pass LayerNorm statistics like torch.nn.LayerNorm)."""
    h = x @ p["w1"].T + p["b1"].T
    m = h.mean(-1, keepdims=True)
    v = ((h - m) ** 2).mean(-1, keepdims=True)
    h = jnp.maximum((h - m) / jnp.sqrt(v + LN_EPS) * p["g1"].T + p["be1"].T, 0.0)

    h = h @ p["w2"].T + p["b2"].T
    m = h.mean(-1, keepdims=True)
    v = ((h - m) ** 2).mean(-1, keepdims=True)
    h = jnp.maximum((h - m) / jnp.sqrt(v + LN_EPS) * p["g2"].T + p["be2"].T, 0.0)

    h = h @ p["w3"] + p["b3"][0]
    return jax.nn.sigmoid(h)


if __name__ == "__main__":
    key = jax.random.PRNGKey(0)
    k_param, k_x1, k_x2, k_x3 = jax.random.split(key, 4)
    params = init_params(k_param)

    # 32: the module's own self-test shape (single ragged tile).
    # 300: ragged batch, single tile.
    # 4500: multi-tile grid (tile_b=2048, 3 tiles, ragged last tile).
    for batch, kx in ((32, k_x1), (300, k_x2), (4500, k_x3)):
        x = jax.random.normal(kx, (batch, INPUT_DIM), jnp.float32)
        out = jax.block_until_ready(mlp_forward(x, params))
        ref = mlp_reference(x, params)
        assert out.shape == (batch, OUTPUT_DIM)
        assert jnp.allclose(out, ref, atol=2e-5, rtol=1e-5), \
            f"mismatch vs reference (B={batch})"

    print("KERNEL_OK")
</pallas_src>

<mosaic_0001>
module attributes {stable_mosaic.version = 11 : i64} {
  func.func @mlp_kernel(%arg0: i32, %arg1: memref<128x5xf32, #tpu.memory_space<vmem>>, %arg2: memref<64x5xf32, #tpu.memory_space<vmem>>, %arg3: memref<64x1xf32, #tpu.memory_space<vmem>>, %arg4: memref<64x1xf32, #tpu.memory_space<vmem>>, %arg5: memref<64x1xf32, #tpu.memory_space<vmem>>, %arg6: memref<32x64xf32, #tpu.memory_space<vmem>>, %arg7: memref<32x1xf32, #tpu.memory_space<vmem>>, %arg8: memref<32x1xf32, #tpu.memory_space<vmem>>, %arg9: memref<32x1xf32, #tpu.memory_space<vmem>>, %arg10: memref<32x1xf32, #tpu.memory_space<vmem>>, %arg11: memref<1x1xf32, #tpu.memory_space<vmem>>, %arg12: memref<1x128xf32, #tpu.memory_space<vmem>>) attributes {dimension_semantics = [#tpu.dimension_semantics<parallel>], iteration_bounds = array<i64: 1>, scalar_prefetch = 0 : i64, scratch_operands = 0 : i64, tpu.core_type = #tpu.core_type<tc>, window_params = [{transform_indices = @transform_0, window_bounds = array<i64: 128, 5>}, {pipeline_mode = #tpu.pipeline_mode<synchronous>, transform_indices = @transform_1, window_bounds = array<i64: 64, 5>}, {pipeline_mode = #tpu.pipeline_mode<synchronous>, transform_indices = @transform_2, window_bounds = array<i64: 64, 1>}, {pipeline_mode = #tpu.pipeline_mode<synchronous>, transform_indices = @transform_3, window_bounds = array<i64: 64, 1>}, {pipeline_mode = #tpu.pipeline_mode<synchronous>, transform_indices = @transform_4, window_bounds = array<i64: 64, 1>}, {pipeline_mode = #tpu.pipeline_mode<synchronous>, transform_indices = @transform_5, window_bounds = array<i64: 32, 64>}, {pipeline_mode = #tpu.pipeline_mode<synchronous>, transform_indices = @transform_6, window_bounds = array<i64: 32, 1>}, {pipeline_mode = #tpu.pipeline_mode<synchronous>, transform_indices = @transform_7, window_bounds = array<i64: 32, 1>}, {pipeline_mode = #tpu.pipeline_mode<synchronous>, transform_indices = @transform_8, window_bounds = array<i64: 32, 1>}, {pipeline_mode = #tpu.pipeline_mode<synchronous>, transform_indices = @transform_9, window_bounds = array<i64: 32, 1>}, {pipeline_mode = #tpu.pipeline_mode<synchronous>, transform_indices = @transform_10, window_bounds = array<i64: 1, 1>}, {transform_indices = @transform_11, window_bounds = array<i64: 1, 128>}]} {
    %c0 = arith.constant 0 : index
    %c0_0 = arith.constant 0 : index
    %0 = vector.load %arg1[%c0, %c0_0] : memref<128x5xf32, #tpu.memory_space<vmem>>, vector<128x5xf32>
    %c0_1 = arith.constant 0 : index
    %c0_2 = arith.constant 0 : index
    %1 = vector.load %arg2[%c0_1, %c0_2] : memref<64x5xf32, #tpu.memory_space<vmem>>, vector<64x5xf32>
    %cst = arith.constant dense<0.000000e+00> : vector<64x128xf32>
    %2 = tpu.matmul %1, %0, %cst {dimension_numbers = #tpu.dot_dimension_numbers<[1], [1], [0], [0], [0, 0, 1, 0], [], []>} : vector<64x5xf32>, vector<128x5xf32>, vector<64x128xf32> -> vector<64x128xf32>
    %c0_3 = arith.constant 0 : index
    %c0_4 = arith.constant 0 : index
    %3 = vector.load %arg3[%c0_3, %c0_4] : memref<64x1xf32, #tpu.memory_space<vmem>>, vector<64x1xf32>
    %4 = vector.broadcast %3 : vector<64x1xf32> to vector<64x128xf32>
    %5 = arith.addf %2, %4 : vector<64x128xf32>
    %c0_5 = arith.constant 0 : index
    %c0_6 = arith.constant 0 : index
    %6 = vector.load %arg4[%c0_5, %c0_6] : memref<64x1xf32, #tpu.memory_space<vmem>>, vector<64x1xf32>
    %c0_7 = arith.constant 0 : index
    %c0_8 = arith.constant 0 : index
    %7 = vector.load %arg5[%c0_7, %c0_8] : memref<64x1xf32, #tpu.memory_space<vmem>>, vector<64x1xf32>
    %cst_9 = arith.constant dense<0.000000e+00> : vector<128xf32>
    %8 = vector.multi_reduction <add>, %5, %cst_9 [0] : vector<64x128xf32> to vector<128xf32>
    %9 = vector.shape_cast %8 : vector<128xf32> to vector<1x128xf32>
    %cst_10 = arith.constant 1.562500e-02 : f32
    %10 = vector.broadcast %cst_10 : f32 to vector<1x128xf32>
    %11 = arith.mulf %9, %10 : vector<1x128xf32>
    %12 = arith.mulf %5, %5 : vector<64x128xf32>
    %cst_11 = arith.constant dense<0.000000e+00> : vector<128xf32>
    %13 = vector.multi_reduction <add>, %12, %cst_11 [0] : vector<64x128xf32> to vector<128xf32>
    %14 = vector.shape_cast %13 : vector<128xf32> to vector<1x128xf32>
    %cst_12 = arith.constant 1.562500e-02 : f32
    %15 = vector.broadcast %cst_12 : f32 to vector<1x128xf32>
    %16 = arith.mulf %14, %15 : vector<1x128xf32>
    %17 = arith.mulf %11, %11 : vector<1x128xf32>
    %18 = arith.subf %16, %17 : vector<1x128xf32>
    %cst_13 = arith.constant 0.000000e+00 : f32
    %19 = vector.broadcast %cst_13 : f32 to vector<1x128xf32>
    %20 = arith.maximumf %18, %19 : vector<1x128xf32>
    %cst_14 = arith.constant 9.99999974E-6 : f32
    %21 = vector.broadcast %cst_14 : f32 to vector<1x128xf32>
    %22 = arith.addf %20, %21 : vector<1x128xf32>
    %23 = math.rsqrt %22 : vector<1x128xf32>
    %24 = vector.broadcast %11 : vector<1x128xf32> to vector<64x128xf32>
    %25 = arith.subf %5, %24 : vector<64x128xf32>
    %26 = vector.broadcast %23 : vector<1x128xf32> to vector<64x128xf32>
    %27 = arith.mulf %25, %26 : vector<64x128xf32>
    %28 = vector.broadcast %6 : vector<64x1xf32> to vector<64x128xf32>
    %29 = arith.mulf %27, %28 : vector<64x128xf32>
    %30 = vector.broadcast %7 : vector<64x1xf32> to vector<64x128xf32>
    %31 = arith.addf %29, %30 : vector<64x128xf32>
    %cst_15 = arith.constant 0.000000e+00 : f32
    %32 = vector.broadcast %cst_15 : f32 to vector<64x128xf32>
    %33 = arith.maximumf %31, %32 : vector<64x128xf32>
    %c0_16 = arith.constant 0 : index
    %c0_17 = arith.constant 0 : index
    %34 = vector.load %arg6[%c0_16, %c0_17] : memref<32x64xf32, #tpu.memory_space<vmem>>, vector<32x64xf32>
    %cst_18 = arith.constant dense<0.000000e+00> : vector<32x128xf32>
    %35 = tpu.matmul %34, %33, %cst_18 {dimension_numbers = #tpu.dot_dimension_numbers<[1], [0], [0], [1], [0, 0, 1, 1], [], []>} : vector<32x64xf32>, vector<64x128xf32>, vector<32x128xf32> -> vector<32x128xf32>
    %c0_19 = arith.constant 0 : index
    %c0_20 = arith.constant 0 : index
    %36 = vector.load %arg7[%c0_19, %c0_20] : memref<32x1xf32, #tpu.memory_space<vmem>>, vector<32x1xf32>
    %37 = vector.broadcast %36 : vector<32x1xf32> to vector<32x128xf32>
    %38 = arith.addf %35, %37 : vector<32x128xf32>
    %c0_21 = arith.constant 0 : index
    %c0_22 = arith.constant 0 : index
    %39 = vector.load %arg8[%c0_21, %c0_22] : memref<32x1xf32, #tpu.memory_space<vmem>>, vector<32x1xf32>
    %c0_23 = arith.constant 0 : index
    %c0_24 = arith.constant 0 : index
    %40 = vector.load %arg9[%c0_23, %c0_24] : memref<32x1xf32, #tpu.memory_space<vmem>>, vector<32x1xf32>
    %cst_25 = arith.constant dense<0.000000e+00> : vector<128xf32>
    %41 = vector.multi_reduction <add>, %38, %cst_25 [0] : vector<32x128xf32> to vector<128xf32>
    %42 = vector.shape_cast %41 : vector<128xf32> to vector<1x128xf32>
    %cst_26 = arith.constant 3.125000e-02 : f32
    %43 = vector.broadcast %cst_26 : f32 to vector<1x128xf32>
    %44 = arith.mulf %42, %43 : vector<1x128xf32>
    %45 = arith.mulf %38, %38 : vector<32x128xf32>
    %cst_27 = arith.constant dense<0.000000e+00> : vector<128xf32>
    %46 = vector.multi_reduction <add>, %45, %cst_27 [0] : vector<32x128xf32> to vector<128xf32>
    %47 = vector.shape_cast %46 : vector<128xf32> to vector<1x128xf32>
    %cst_28 = arith.constant 3.125000e-02 : f32
    %48 = vector.broadcast %cst_28 : f32 to vector<1x128xf32>
    %49 = arith.mulf %47, %48 : vector<1x128xf32>
    %50 = arith.mulf %44, %44 : vector<1x128xf32>
    %51 = arith.subf %49, %50 : vector<1x128xf32>
    %cst_29 = arith.constant 0.000000e+00 : f32
    %52 = vector.broadcast %cst_29 : f32 to vector<1x128xf32>
    %53 = arith.maximumf %51, %52 : vector<1x128xf32>
    %cst_30 = arith.constant 9.99999974E-6 : f32
    %54 = vector.broadcast %cst_30 : f32 to vector<1x128xf32>
    %55 = arith.addf %53, %54 : vector<1x128xf32>
    %56 = math.rsqrt %55 : vector<1x128xf32>
    %57 = vector.broadcast %44 : vector<1x128xf32> to vector<32x128xf32>
    %58 = arith.subf %38, %57 : vector<32x128xf32>
    %59 = vector.broadcast %56 : vector<1x128xf32> to vector<32x128xf32>
    %60 = arith.mulf %58, %59 : vector<32x128xf32>
    %61 = vector.broadcast %39 : vector<32x1xf32> to vector<32x128xf32>
    %62 = arith.mulf %60, %61 : vector<32x128xf32>
    %63 = vector.broadcast %40 : vector<32x1xf32> to vector<32x128xf32>
    %64 = arith.addf %62, %63 : vector<32x128xf32>
    %cst_31 = arith.constant 0.000000e+00 : f32
    %65 = vector.broadcast %cst_31 : f32 to vector<32x128xf32>
    %66 = arith.maximumf %64, %65 : vector<32x128xf32>
    %c0_32 = arith.constant 0 : index
    %c0_33 = arith.constant 0 : index
    %67 = vector.load %arg10[%c0_32, %c0_33] : memref<32x1xf32, #tpu.memory_space<vmem>>, vector<32x1xf32>
    %68 = vector.broadcast %67 : vector<32x1xf32> to vector<32x128xf32>
    %69 = arith.mulf %66, %68 : vector<32x128xf32>
    %cst_34 = arith.constant dense<0.000000e+00> : vector<128xf32>
    %70 = vector.multi_reduction <add>, %69, %cst_34 [0] : vector<32x128xf32> to vector<128xf32>
    %71 = vector.shape_cast %70 : vector<128xf32> to vector<1x128xf32>
    %c0_35 = arith.constant 0 : index
    %c0_36 = arith.constant 0 : index
    %72 = vector.load %arg11[%c0_35, %c0_36] : memref<1x1xf32, #tpu.memory_space<vmem>>, vector<1x1xf32>
    %73 = vector.broadcast %72 : vector<1x1xf32> to vector<1x128xf32>
    %74 = arith.addf %71, %73 : vector<1x128xf32>
    %75 = arith.negf %74 : vector<1x128xf32>
    %76 = math.exp %75 : vector<1x128xf32>
    %cst_37 = arith.constant 1.000000e+00 : f32
    %77 = vector.broadcast %cst_37 : f32 to vector<1x128xf32>
    %78 = arith.addf %77, %76 : vector<1x128xf32>
    %79 = arith.divf %77, %78 : vector<1x128xf32>
    %c0_38 = arith.constant 0 : index
    %c0_39 = arith.constant 0 : index
    %80 = vector.load %arg12[%c0_38, %c0_39] : memref<1x128xf32, #tpu.memory_space<vmem>>, vector<1x128xf32>
    tpu.vector_store %arg12[%c0_38, %c0_39], %79 {strides = array<i32>} : memref<1x128xf32, #tpu.memory_space<vmem>>, vector<1x128xf32>,
    return
  }
  func.func @transform_0(%arg0: i32) -> (i32, i32) {
    %c0_i32 = arith.constant 0 : i32
    %c0_i32_0 = arith.constant 0 : i32
    return %arg0, %c0_i32 : i32, i32
  }
  func.func @transform_1(%arg0: i32) -> (i32, i32) {
    %c0_i32 = arith.constant 0 : i32
    %c0_i32_0 = arith.constant 0 : i32
    %c0_i32_1 = arith.constant 0 : i32
    return %c0_i32, %c0_i32_0 : i32, i32
  }
  func.func @transform_2(%arg0: i32) -> (i32, i32) {
    %c0_i32 = arith.constant 0 : i32
    %c0_i32_0 = arith.constant 0 : i32
    %c0_i32_1 = arith.constant 0 : i32
    return %c0_i32, %c0_i32_0 : i32, i32
  }
  func.func @transform_3(%arg0: i32) -> (i32, i32) {
    %c0_i32 = arith.constant 0 : i32
    %c0_i32_0 = arith.constant 0 : i32
    %c0_i32_1 = arith.constant 0 : i32
    return %c0_i32, %c0_i32_0 : i32, i32
  }
  func.func @transform_4(%arg0: i32) -> (i32, i32) {
    %c0_i32 = arith.constant 0 : i32
    %c0_i32_0 = arith.constant 0 : i32
    %c0_i32_1 = arith.constant 0 : i32
    return %c0_i32, %c0_i32_0 : i32, i32
  }
  func.func @transform_5(%arg0: i32) -> (i32, i32) {
    %c0_i32 = arith.constant 0 : i32
    %c0_i32_0 = arith.constant 0 : i32
    %c0_i32_1 = arith.constant 0 : i32
    return %c0_i32, %c0_i32_0 : i32, i32
  }
  func.func @transform_6(%arg0: i32) -> (i32, i32) {
    %c0_i32 = arith.constant 0 : i32
    %c0_i32_0 = arith.constant 0 : i32
    %c0_i32_1 = arith.constant 0 : i32
    return %c0_i32, %c0_i32_0 : i32, i32
  }
  func.func @transform_7(%arg0: i32) -> (i32, i32) {
    %c0_i32 = arith.constant 0 : i32
    %c0_i32_0 = arith.constant 0 : i32
    %c0_i32_1 = arith.constant 0 : i32
    return %c0_i32, %c0_i32_0 : i32, i32
  }
  func.func @transform_8(%arg0: i32) -> (i32, i32) {
    %c0_i32 = arith.constant 0 : i32
    %c0_i32_0 = arith.constant 0 : i32
    %c0_i32_1 = arith.constant 0 : i32
    return %c0_i32, %c0_i32_0 : i32, i32
  }
  func.func @transform_9(%arg0: i32) -> (i32, i32) {
    %c0_i32 = arith.constant 0 : i32
    %c0_i32_0 = arith.constant 0 : i32
    %c0_i32_1 = arith.constant 0 : i32
    return %c0_i32, %c0_i32_0 : i32, i32
  }
  func.func @transform_10(%arg0: i32) -> (i32, i32) {
    %c0_i32 = arith.constant 0 : i32
    %c0_i32_0 = arith.constant 0 : i32
    %c0_i32_1 = arith.constant 0 : i32
    return %c0_i32, %c0_i32_0 : i32, i32
  }
  func.func @transform_11(%arg0: i32) -> (i32, i32) {
    %c0_i32 = arith.constant 0 : i32
    %c0_i32_0 = arith.constant 0 : i32
    return %c0_i32, %arg0 : i32, i32
  }
}

</mosaic_0001>

<bundles_post_ra>
// kernel: mlp_forward.1
= control target key start
LH: loop header
LB: loop body
LE: loop exit
PB: predicated region body
PF: predicated region fallthrough
CT: control target
= control target key end

     0   :  { %vm112_vm0 = vcmask 39936   ;;  %v955_v3 = vmov 0   ;;  %vm495_vm2 = vcmask 523264   ;;  %s1312_s0 = inlined_call_operand.vmem [shape: f32[32,5], index: 0, kind: input, shape index: {}]   ;;  %s1313_s10 = inlined_call_operand.<no memory space> [shape: f32[1,1], index: 10, kind: input, shape index: {}]   ;;  %s1314_s1 = inlined_call_operand.vmem [shape: f32[64,5], index: 1, kind: input, shape index: {}]   ;;  %s1315_s2 = inlined_call_operand.vmem [shape: f32[64,1], index: 2, kind: input, shape index: {}]   ;;  %s1316_s3 = inlined_call_operand.vmem [shape: f32[64,1], index: 3, kind: input, shape index: {}]   ;;  %s1317_s4 = inlined_call_operand.vmem [shape: f32[64,1], index: 4, kind: input, shape index: {}]   ;;  %s1318_s6 = inlined_call_operand.vmem [shape: f32[32,1], index: 6, kind: input, shape index: {}]   ;;  %s1319_s7 = inlined_call_operand.vmem [shape: f32[32,1], index: 7, kind: input, shape index: {}]   ;;  %s1320_s8 = inlined_call_operand.vmem [shape: f32[32,1], index: 8, kind: input, shape index: {}]   ;;  %s1321_s9 = inlined_call_operand.vmem [shape: f32[32,1], index: 9, kind: input, shape index: {}]   ;;  %s1322_s5 = inlined_call_operand.vmem [shape: f32[32,64], index: 5, kind: input, shape index: {}]   ;;  %s1323_s11 = inlined_call_operand.vmem [shape: f32[1,128], index: 11, kind: output, shape index: {}]  }
   0x1   :  { %v40_v0 = vld [vmem:[%s1312_s0] sm:$0xff]  ;;  %v41_v1 = vld [vmem:[%s1312_s0 + $0x8] sm:$0xff]  ;;  %vm1024_vm1 = vmpackc.low %vm112_vm0, %vm112_vm0  ;;  %945 = vset.pattern.permute.xlu0 %v955_v3  ;;  %946 = vset.pattern.permute.xlu1 %v955_v3  ;;  %v16_v4 = vstv %s1313_s10 }
   0x2   :  { %v880_v5 = vpack.c.bf16 %v41_v1, %v40_v0  ;;  %v42_v6 = vld [vmem:[%s1312_s0 + $0x10] sm:$0xff]  ;;  %v43_v7 = vld [vmem:[%s1312_s0 + $0x18] sm:$0xff]  ;;  %17 = vst [vmem:[#allocation2] sm:$0x1] %v16_v4  ;;  %v56_v9 = vld [vmem:[%s1314_s1] sm:$0xff] }
   0x3   :  { %v886_v8 = vpack.c.bf16 %v43_v7, %v42_v6  ;;  %v44_v10 = vld [vmem:[%s1312_s0 + $0x20] sm:$0xff]  ;;  %v45_v11 = vld [vmem:[%s1312_s0 + $0x28] sm:$0xff]  ;;  %846 = vmatprep.mubr.msk.f32.mxu0 %vm112_vm0, %v56_v9  ;;  %v66_v14 = vld [vmem:[%s1315_s2 + $0x10] sm:$0xff] }
   0x4   :  { %882 = vmatprep.subr.msk.bf16.mxu0 %vm1024_vm1, %v880_v5  ;;  %v64_v12 = vld [vmem:[%s1315_s2] sm:$0xff]  ;;  %v65_v13 = vld [vmem:[%s1315_s2 + $0x8] sm:$0xff]  ;;  %v892_v15 = vpack.c.bf16 %v45_v11, %v44_v10  ;;  %84 = vperm.xlu1 %946, %v66_v14   ;;  %v67_v16 = vld [vmem:[%s1315_s2 + $0x18] sm:$0xff] }
   0x5   :  { %885 = vmatpush3.bf16.xpose.msk.msra.mxu0 %vm1024_vm1, %v880_v5  ;;  %74 = vperm.xlu0 %945, %v64_v12   ;;  %v68_v17 = vld [vmem:[%s1315_s2 + $0x20] sm:$0xff]  ;;  %v46_v18 = vld [vmem:[%s1312_s0 + $0x30] sm:$0xff]  ;;  %v47_v19 = vld [vmem:[%s1312_s0 + $0x38] sm:$0xff] }
   0x6   :  { %888 = vmatprep.subr.msk.bf16.mxu0 %vm1024_vm1, %v886_v8  ;;  %v69_v20 = vld [vmem:[%s1315_s2 + $0x28] sm:$0xff]  ;;  %v70_v21 = vld [vmem:[%s1315_s2 + $0x30] sm:$0xff]  ;;  %v898_v22 = vpack.c.bf16 %v47_v19, %v46_v18  ;;  %v71_v23 = vld [vmem:[%s1315_s2 + $0x38] sm:$0xff] }
   0x7   :  { %v290_v24 = vld [vmem:[%s1316_s3] sm:$0xff]  ;;  %v49_v26 = vld [vmem:[%s1312_s0 + $0x48] sm:$0xff]  ;;  %v292_v31 = vld [vmem:[%s1316_s3 + $0x10] sm:$0xff] }
   0x8   :  { %89 = vperm.xlu1 %946, %v67_v16   ;;  %v48_v25 = vld [vmem:[%s1312_s0 + $0x40] sm:$0xff]  ;;  %v291_v27 = vld [vmem:[%s1316_s3 + $0x8] sm:$0xff]  ;;  %v50_v32 = vld [vmem:[%s1312_s0 + $0x50] sm:$0xff] }
   0x9   :  { %79 = vperm.xlu0 %945, %v65_v13   ;;  %v298_v28 = vld [vmem:[%s1317_s4] sm:$0xff]  ;;  %v904_v29 = vpack.c.bf16 %v49_v26, %v48_v25  ;;  %v299_v30 = vld [vmem:[%s1317_s4 + $0x8] sm:$0xff]  ;;  %v51_v33 = vld [vmem:[%s1312_s0 + $0x58] sm:$0xff] }
   0xa   :  { %v293_v34 = vld [vmem:[%s1316_s3 + $0x18] sm:$0xff]  ;;  %v300_v35 = vld [vmem:[%s1317_s4 + $0x10] sm:$0xff]  ;;  %v910_v36 = vpack.c.bf16 %v51_v33, %v50_v32  ;;  %v294_v38 = vld [vmem:[%s1316_s3 + $0x20] sm:$0xff] }
   0xb   :  { %v301_v37 = vld [vmem:[%s1317_s4 + $0x18] sm:$0xff]  ;;  %v52_v39 = vld [vmem:[%s1312_s0 + $0x60] sm:$0xff]  ;;  %v53_v40 = vld [vmem:[%s1312_s0 + $0x68] sm:$0xff] }
   0xc   :  { %99 = vperm.xlu1 %946, %v69_v20   ;;  %v295_v41 = vld [vmem:[%s1316_s3 + $0x28] sm:$0xff]  ;;  %v302_v42 = vld [vmem:[%s1317_s4 + $0x20] sm:$0xff]  ;;  %v916_v43 = vpack.c.bf16 %v53_v40, %v52_v39  ;;  %v296_v45 = vld [vmem:[%s1316_s3 + $0x30] sm:$0xff] }
   0xd   :  { %891 = vmatpush3.bf16.xpose.msk.msra.mxu0 %vm1024_vm1, %v886_v8  ;;  %94 = vperm.xlu0 %945, %v68_v17   ;;  %v303_v44 = vld [vmem:[%s1317_s4 + $0x28] sm:$0xff]  ;;  %v54_v46 = vld [vmem:[%s1312_s0 + $0x70] sm:$0xff]  ;;  %v55_v47 = vld [vmem:[%s1312_s0 + $0x78] sm:$0xff] }
   0xe   :  { %894 = vmatprep.subr.msk.bf16.mxu0 %vm1024_vm1, %v892_v15  ;;  %v297_v48 = vld [vmem:[%s1316_s3 + $0x38] sm:$0xff]  ;;  %v304_v49 = vld [vmem:[%s1317_s4 + $0x30] sm:$0xff]  ;;  %v922_v50 = vpack.c.bf16 %v55_v47, %v54_v46  ;;  %v471_v52 = vld [vmem:[%s1318_s6] sm:$0xff] }
   0xf   :  { %v305_v51 = vld [vmem:[%s1317_s4 + $0x38] sm:$0xff]  ;;  %v472_v53 = vld [vmem:[%s1318_s6 + $0x8] sm:$0xff]  ;;  %v473_v54 = vld [vmem:[%s1318_s6 + $0x10] sm:$0xff] }
  0x10   :  { %109 = vperm.xlu1 %946, %v71_v23   ;;  %v474_v55 = vld [vmem:[%s1318_s6 + $0x18] sm:$0xff]  ;;  %v593_v56 = vld [vmem:[%s1319_s7] sm:$0xff]  ;;  %v594_v57 = vld [vmem:[%s1319_s7 + $0x8] sm:$0xff] }
  0x11   :  { %104 = vperm.xlu0 %945, %v70_v21   ;;  %v57_v58 = vld [vmem:[%s1314_s1 + $0x8] sm:$0xff]  ;;  %v595_v59 = vld [vmem:[%s1319_s7 + $0x10] sm:$0xff]  ;;  %v597_v61 = vld [vmem:[%s1320_s8] sm:$0xff] }
  0x12   :  { %v58_v60 = vld [vmem:[%s1314_s1 + $0x10] sm:$0xff]  ;;  %v59_v62 = vld [vmem:[%s1314_s1 + $0x18] sm:$0xff]  ;;  %v598_v63 = vld [vmem:[%s1320_s8 + $0x8] sm:$0xff] }
  0x13   :  { %v60_v0 = vld [vmem:[%s1314_s1 + $0x20] sm:$0xff]  ;;  %v596_v1 = vld [vmem:[%s1319_s7 + $0x18] sm:$0xff]  ;;  %v61_v2 = vld [vmem:[%s1314_s1 + $0x28] sm:$0xff] }
  0x14   :  { %370 = vperm.xlu1 %946, %v291_v27   ;;  %v599_v3 = vld [vmem:[%s1320_s8 + $0x10] sm:$0xff]  ;;  %v600_v5 = vld [vmem:[%s1320_s8 + $0x18] sm:$0xff]  ;;  %v690_v7 = vld [vmem:[%s1321_s9] sm:$0xff] }
  0x15   :  { %897 = vmatpush3.bf16.xpose.msk.msra.mxu0 %vm1024_vm1, %v892_v15  ;;  %365 = vperm.xlu0 %945, %v290_v24   ;;  %v62_v4 = vld [vmem:[%s1314_s1 + $0x30] sm:$0xff]  ;;  %v63_v6 = vld [vmem:[%s1314_s1 + $0x38] sm:$0xff]  ;;  %v691_v8 = vld [vmem:[%s1321_s9 + $0x8] sm:$0xff] }
  0x16   :  { %900 = vmatprep.subr.msk.bf16.mxu0 %vm1024_vm1, %v898_v22  ;;  %v692_v9 = vld [vmem:[%s1321_s9 + $0x10] sm:$0xff]  ;;  %v693_v10 = vld [vmem:[%s1321_s9 + $0x18] sm:$0xff]  ;;  %v727_v11 = vld [vmem:[#allocation2] sm:$0x1] }
  0x17   :  { %v467_v12 = vld [vmem:[%s1322_s5] sm:$0xff] }
  0x18   :  { %418 = vperm.xlu1 %946, %v299_v30   ;;  %874 = vmatprep.mubr.msk.f32.mxu1 %vm495_vm2, %v467_v12 }
  0x19   :  { %413 = vperm.xlu0 %945, %v298_v28  }
  0x1c   :  { %380 = vperm.xlu1 %946, %v293_v34  }
  0x1d   :  { %903 = vmatpush3.bf16.xpose.msk.msra.mxu0 %vm1024_vm1, %v898_v22  ;;  %375 = vperm.xlu0 %945, %v292_v31  }
  0x1e   :  { %906 = vmatprep.subr.msk.bf16.mxu0 %vm1024_vm1, %v904_v29 }
  0x20   :  { %428 = vperm.xlu1 %946, %v301_v37  }
  0x21   :  { %423 = vperm.xlu0 %945, %v300_v35  }
  0x24   :  { %390 = vperm.xlu1 %946, %v295_v41  }
  0x25   :  { %909 = vmatpush3.bf16.xpose.msk.msra.mxu0 %vm1024_vm1, %v904_v29  ;;  %385 = vperm.xlu0 %945, %v294_v38  }
  0x26   :  { %912 = vmatprep.subr.msk.bf16.mxu0 %vm1024_vm1, %v910_v36 }
  0x28   :  { %438 = vperm.xlu1 %946, %v303_v44  }
  0x29   :  { %433 = vperm.xlu0 %945, %v302_v42  }
  0x2c   :  { %400 = vperm.xlu1 %946, %v297_v48  }
  0x2d   :  { %915 = vmatpush3.bf16.xpose.msk.msra.mxu0 %vm1024_vm1, %v910_v36  ;;  %395 = vperm.xlu0 %945, %v296_v45  }
  0x2e   :  { %918 = vmatprep.subr.msk.bf16.mxu0 %vm1024_vm1, %v916_v43 }
  0x30   :  { %448 = vperm.xlu1 %946, %v305_v51  }
  0x31   :  { %443 = vperm.xlu0 %945, %v304_v49  }
  0x34   :  { %482 = vperm.xlu1 %946, %v472_v53  }
  0x35   :  { %921 = vmatpush3.bf16.xpose.msk.msra.mxu0 %vm1024_vm1, %v916_v43  ;;  %477 = vperm.xlu0 %945, %v471_v52  }
  0x36   :  { %924 = vmatprep.subr.msk.bf16.mxu0 %vm1024_vm1, %v922_v50 }
  0x38   :  { %492 = vperm.xlu1 %946, %v474_v55  }
  0x39   :  { %487 = vperm.xlu0 %945, %v473_v54  }
  0x3c   :  { %645 = vperm.xlu1 %946, %v594_v57  }
  0x3d   :  { %927 = vmatpush3.bf16.xpose.msk.msra.mxu0 %vm1024_vm1, %v922_v50  ;;  %640 = vperm.xlu0 %945, %v593_v56  }
  0x40   :  { %664 = vperm.xlu1 %946, %v597_v61  }
  0x41   :  { %650 = vperm.xlu0 %945, %v595_v59  }
  0x44   :  { %847 = vmatmul.mubr.msk.f32.vlgmr.msra.gmra.mrb[0].mxu0 %vm112_vm0, %v57_v58  ;;  %655 = vperm.xlu1 %946, %v596_v1  }
  0x45   :  { %849 = vmatprep.mubr.msk.f32.mxu0 %vm112_vm0, %v58_v60  ;;  %669 = vperm.xlu0 %945, %v598_v63  }
  0x48   :  { %850 = vmatmul.mubr.msk.f32.gmra.mrb[2].mxu0 %vm112_vm0, %v59_v62  ;;  %679 = vperm.xlu1 %946, %v600_v5  }
  0x49   :  { %852 = vmatprep.mubr.msk.f32.mxu0 %vm112_vm0, %v60_v0  ;;  %674 = vperm.xlu0 %945, %v599_v3  }
  0x4c   :  { %853 = vmatmul.mubr.msk.f32.gmra.mrb[4].mxu0 %vm112_vm0, %v61_v2  ;;  %701 = vperm.xlu1 %946, %v691_v8  }
  0x4d   :  { %855 = vmatprep.mubr.msk.f32.mxu0 %vm112_vm0, %v62_v4  ;;  %696 = vperm.xlu0 %945, %v690_v7  }
  0x50   :  { %856 = vmatmul.mubr.msk.f32.gmra.mrb[6].mxu0 %vm112_vm0, %v63_v6  ;;  %711 = vperm.xlu1 %946, %v693_v10  }
  0x51   :  { %706 = vperm.xlu0 %945, %v692_v9  }
  0x55   :  { %730 = vperm.xlu0 %945, %v727_v11  }
  0x83   :  { %v85_v14 = vpop.permute.xlu1 %84 }
  0x84   :  { %v75_v13 = vpop.permute.xlu0 %74 }
  0x87   :  { %v90_v16 = vpop.permute.xlu1 %89 }
  0x88   :  { %v80_v15 = vpop.permute.xlu0 %79 }
  0x8b   :  { %v100_v22 = vpop.permute.xlu1 %99 }
  0x8c   :  { %v95_v20 = vpop.permute.xlu0 %94 }
  0x8f   :  { %v110_v35 = vpop.permute.xlu1 %109 }
  0x90   :  { %v105_v31 = vpop.permute.xlu0 %104 }
  0x93   :  { %v371_v53 = vpop.permute.xlu1 %370 }
  0x94   :  { %v366_v48 = vpop.permute.xlu0 %365 }
  0x97   :  { %v419_v63 = vpop.permute.xlu1 %418 }
  0x98   :  { %v414_v60 = vpop.permute.xlu0 %413 }
  0x9b   :  { %v381_v7 = vpop.permute.xlu1 %380 }
  0x9c   :  { %v376_v4 = vpop.permute.xlu0 %375 }
  0xa0   :  { %v424_v12 = vpop.permute.xlu0 %423 }
 0x117   :  { %v848_v17 = vpop.f32.mrb[0].mxu0 }
 0x118   :  { %v1261_v18 = vadd.f32 %v848_v17, %v80_v15  ;;  %v251_v19 = vpop.f32.mrb[1].mxu0  ;;  %v429_v15 = vpop.permute.xlu1 %428 }
 0x119   :  { %v1263_v21 = vadd.f32 %v251_v19, %v75_v13 }
 0x11a   :  { %v321_v23 = vmul.f32 %v1261_v18, %v1261_v18 }
 0x11b   :  { %v306_v24 = vadd.f32 %v1261_v18, %v1263_v21  ;;  %v320_v25 = vmul.f32 %v1263_v21, %v1263_v21  ;;  %v851_v26 = vpop.f32.mrb[2].mxu0 }
 0x11c   :  { %v261_v27 = vpop.f32.mrb[3].mxu0  ;;  %v1271_v29 = vadd.f32 %v851_v26, %v90_v16 }
 0x11d   :  { %v328_v28 = vadd.f32 %v321_v23, %v320_v25  ;;  %v1273_v30 = vadd.f32 %v261_v27, %v85_v14 }
 0x11e   :  { %v323_v38 = vmul.f32 %v1271_v29, %v1271_v29 }
 0x11f   :  { %v307_v32 = vadd.f32 %v306_v24, %v1273_v30  ;;  %v322_v33 = vmul.f32 %v1273_v30, %v1273_v30  ;;  %v854_v34 = vpop.f32.mrb[4].mxu0 }
 0x120   :  { %v1278_v36 = vadd.f32 %v854_v34, %v100_v22  ;;  %v271_v37 = vpop.f32.mrb[5].mxu0 }
 0x121   :  { %v329_v39 = vadd.f32 %v328_v28, %v322_v33  ;;  %v1282_v40 = vadd.f32 %v271_v37, %v95_v20  ;;  %v308_v41 = vadd.f32 %v307_v32, %v1271_v29  ;;  %v391_v33 = vpop.permute.xlu1 %390 }
 0x122   :  { %v325_v46 = vmul.f32 %v1278_v36, %v1278_v36 }
 0x123   :  { %v309_v42 = vadd.f32 %v308_v41, %v1282_v40  ;;  %v324_v43 = vmul.f32 %v1282_v40, %v1282_v40  ;;  %v330_v44 = vadd.f32 %v329_v39, %v323_v38  ;;  %v857_v45 = vpop.f32.mrb[6].mxu0 }
 0x124   :  { %v281_v47 = vpop.f32.mrb[7].mxu0  ;;  %v287_v50 = vadd.f32 %v857_v45, %v110_v35 }
 0x125   :  { %v331_v49 = vadd.f32 %v330_v44, %v324_v43  ;;  %v282_v51 = vadd.f32 %v281_v47, %v105_v31  ;;  %v310_v52 = vadd.f32 %v309_v42, %v1278_v36  ;;  %v386_v31 = vpop.permute.xlu0 %385  ;;  %v439_v37 = vpop.permute.xlu1 %438 }
 0x126   :  { %v327_v57 = vmul.f32 %v287_v50, %v287_v50 }
 0x127   :  { %v311_v54 = vadd.f32 %v310_v52, %v282_v51  ;;  %v326_v55 = vmul.f32 %v282_v51, %v282_v51  ;;  %v332_v56 = vadd.f32 %v331_v49, %v325_v46 }
 0x129   :  { %v312_v58 = vadd.f32 %v311_v54, %v287_v50  ;;  %v333_v59 = vadd.f32 %v332_v56, %v326_v55  ;;  %v434_v35 = vpop.permute.xlu0 %433  ;;  %v401_v38 = vpop.permute.xlu1 %400 }
 0x12b   :  { %v313_v61 = vrot.slane %v312_v58, 4  ;;  %v334_v62 = vadd.f32 %v333_v59, %v327_v57 }
 0x12d   :  { %v314_v0 = vadd.f32 %v313_v61, %v312_v58  ;;  %v335_v1 = vrot.slane %v334_v62, 4  ;;  %v449_v55 = vpop.permute.xlu1 %448 }
 0x12f   :  { %v315_v2 = vrot.slane %v314_v0, 2  ;;  %v336_v3 = vadd.f32 %v335_v1, %v334_v62 }
 0x131   :  { %v316_v5 = vadd.f32 %v315_v2, %v314_v0  ;;  %v337_v6 = vrot.slane %v336_v3, 2 }
 0x133   :  { %v317_v8 = vrot.slane %v316_v5, 1  ;;  %v338_v9 = vadd.f32 %v337_v6, %v336_v3 }
 0x135   :  { %v318_v10 = vadd.f32 %v317_v8, %v316_v5  ;;  %v339_v11 = vrot.slane %v338_v9, 1 }
 0x137   :  { %v319_v13 = vmul.f32 0.015625, %v318_v10  ;;  %v340_v14 = vadd.f32 %v339_v11, %v338_v9 }
 0x139   :  { %v341_v16 = vmul.f32 0.015625, %v340_v14  ;;  %v342_v17 = vmul.f32 %v319_v13, %v319_v13  ;;  %v353_v19 = vsub.f32 %v282_v51, %v319_v13  ;;  %v347_v20 = vsub.f32 %v1263_v21, %v319_v13  ;;  %v396_v21 = vpop.permute.xlu0 %395  ;;  %v483_v14 = vpop.permute.xlu1 %482 }
 0x13a   :  { %v348_v22 = vsub.f32 %v1261_v18, %v319_v13  ;;  %v349_v23 = vsub.f32 %v1273_v30, %v319_v13  ;;  %v350_v24 = vsub.f32 %v1271_v29, %v319_v13  ;;  %v351_v25 = vsub.f32 %v1282_v40, %v319_v13 }
 0x13b   :  { %v343_v26 = vsub.f32 %v341_v16, %v342_v17  ;;  %v352_v27 = vsub.f32 %v1278_v36, %v319_v13  ;;  %v354_v28 = vsub.f32 %v287_v50, %v319_v13 }
 0x13d   :  { %v344_v32 = vmax.f32 %v343_v26, 0.0  ;;  %v444_v49 = vpop.permute.xlu0 %443  ;;  %v493_v26 = vpop.permute.xlu1 %492 }
 0x13f   :  { %v345_v34 = vadd.f32 1e-05, %v344_v32 }
 0x141   :  { %947 = vrsqrt.f32 %v345_v34  ;;  %v478_v13 = vpop.permute.xlu0 %477 }
 0x14b   :  { %v948_v18 = vpop.eup %947 }
 0x14c   :  { %v361_v39 = vmul.f32 %v948_v18, %v353_v19  ;;  %v355_v30 = vmul.f32 %v948_v18, %v347_v20  ;;  %v356_v41 = vmul.f32 %v948_v18, %v348_v22  ;;  %v357_v29 = vmul.f32 %v948_v18, %v349_v23  ;;  %v488_v22 = vpop.permute.xlu0 %487 }
 0x14d   :  { %v358_v42 = vmul.f32 %v948_v18, %v350_v24  ;;  %v359_v40 = vmul.f32 %v948_v18, %v351_v25  ;;  %v360_v43 = vmul.f32 %v948_v18, %v352_v27  ;;  %v362_v44 = vmul.f32 %v948_v18, %v354_v28 }
 0x14e   :  { %v403_v36 = vmul.f32 %v366_v48, %v355_v30  ;;  %v404_v45 = vmul.f32 %v371_v53, %v356_v41  ;;  %v405_v46 = vmul.f32 %v376_v4, %v357_v29  ;;  %v409_v47 = vmul.f32 %v396_v21, %v361_v39 }
 0x14f   :  { %v406_v50 = vmul.f32 %v381_v7, %v358_v42  ;;  %v407_v51 = vmul.f32 %v386_v31, %v359_v40  ;;  %v408_v52 = vmul.f32 %v391_v33, %v360_v43  ;;  %v410_v54 = vmul.f32 %v401_v38, %v362_v44 }
 0x150   :  { %v451_v56 = vadd.f32 %v414_v60, %v403_v36  ;;  %v452_v57 = vadd.f32 %v419_v63, %v404_v45  ;;  %v453_v58 = vadd.f32 %v424_v12, %v405_v46  ;;  %v457_v59 = vadd.f32 %v444_v49, %v409_v47  ;;  %v468_v60 = vld [vmem:[%s1322_s5 + $0x8] sm:$0xff]  ;;  %v469_v63 = vld [vmem:[%s1322_s5 + $0x10] sm:$0xff]  ;;  %v470_v12 = vld [vmem:[%s1322_s5 + $0x18] sm:$0xff]  ;;  %v641_v46 = vpop.permute.xlu0 %640 }
 0x151   :  { %v454_v61 = vadd.f32 %v429_v15, %v406_v50  ;;  %v455_v62 = vadd.f32 %v434_v35, %v407_v51  ;;  %v456_v0 = vadd.f32 %v439_v37, %v408_v52  ;;  %v458_v1 = vadd.f32 %v449_v55, %v410_v54  ;;  %v646_v50 = vpop.permute.xlu1 %645 }
 0x152   :  { %v459_v2 = vmax.f32 %v451_v56, 0.0  ;;  %v460_v3 = vmax.f32 %v452_v57, 0.0  ;;  %v461_v48 = vmax.f32 %v453_v58, 0.0  ;;  %v465_v53 = vmax.f32 %v457_v59, 0.0 }
 0x153   :  { %v462_v4 = vmax.f32 %v454_v61, 0.0  ;;  %v463_v5 = vmax.f32 %v455_v62, 0.0  ;;  %v464_v6 = vmax.f32 %v456_v0, 0.0  ;;  %v466_v7 = vmax.f32 %v458_v1, 0.0 }
 0x154   :  { %v928_v8 = vpack.c.bf16 %v460_v3, %v459_v2  ;;  %v651_v59 = vpop.permute.xlu0 %650 }
 0x155   :  { %v932_v9 = vpack.c.bf16 %v462_v4, %v461_v48  ;;  %v936_v10 = vpack.c.bf16 %v464_v6, %v463_v5  ;;  %v940_v11 = vpack.c.bf16 %v466_v7, %v465_v53  ;;  %v665_v62 = vpop.permute.xlu1 %664 }
 0x156   :  { %929 = vmatprep.subr.bf16.mxu1 %v928_v8 }
 0x157   :  { %931 = vmatpush3.bf16.msra.mxu1 %v928_v8 }
 0x158   :  { %933 = vmatprep.subr.bf16.mxu1 %v932_v9  ;;  %v670_v1 = vpop.permute.xlu0 %669 }
 0x159   :  { %v656_v2 = vpop.permute.xlu1 %655 }
 0x15b   :  { %935 = vmatpush3.bf16.msra.mxu1 %v932_v9 }
 0x15c   :  { %937 = vmatprep.subr.bf16.mxu1 %v936_v10  ;;  %v675_v3 = vpop.permute.xlu0 %674 }
 0x15d   :  { %v680_v53 = vpop.permute.xlu1 %679 }
 0x15f   :  { %939 = vmatpush3.bf16.msra.mxu1 %v936_v10 }
 0x160   :  { %941 = vmatprep.subr.bf16.mxu1 %v940_v11 }
 0x163   :  { %943 = vmatpush3.bf16.msra.mxu1 %v940_v11 }
 0x166   :  { %875 = vmatmul.mubr.msk.f32.vlgmr.msra.gmra.mrb[0].mxu1 %vm495_vm2, %v468_v60  ;;  %v697_v60 = vpop.permute.xlu0 %696 }
 0x167   :  { %877 = vmatprep.mubr.msk.f32.mxu1 %vm495_vm2, %v469_v63 }
 0x16a   :  { %878 = vmatmul.mubr.msk.f32.gmra.mrb[2].mxu1 %vm495_vm2, %v470_v12 }
 0x239   :  { %v876_v15 = vpop.f32.mrb[0].mxu1 }
 0x23a   :  { %v580_v16 = vadd.f32 %v876_v15, %v483_v14  ;;  %v574_v17 = vpop.f32.mrb[1].mxu1  ;;  %v702_v15 = vpop.permute.xlu1 %701 }
 0x23b   :  { %v575_v19 = vadd.f32 %v574_v17, %v478_v13 }
 0x23c   :  { %v612_v20 = vmul.f32 %v580_v16, %v580_v16 }
 0x23d   :  { %v601_v23 = vadd.f32 %v580_v16, %v575_v19  ;;  %v611_v24 = vmul.f32 %v575_v19, %v575_v19  ;;  %v879_v25 = vpop.f32.mrb[2].mxu1 }
 0x23e   :  { %v584_v27 = vpop.f32.mrb[3].mxu1  ;;  %v590_v31 = vadd.f32 %v879_v25, %v493_v26 }
 0x23f   :  { %v615_v28 = vadd.f32 %v612_v20, %v611_v24  ;;  %v585_v32 = vadd.f32 %v584_v27, %v488_v22  ;;  %v707_v24 = vpop.permute.xlu0 %706  ;;  %v712_v27 = vpop.permute.xlu1 %711 }
 0x240   :  { %v614_v35 = vmul.f32 %v590_v31, %v590_v31 }
 0x241   :  { %v602_v33 = vadd.f32 %v601_v23, %v585_v32  ;;  %v613_v34 = vmul.f32 %v585_v32, %v585_v32 }
 0x243   :  { %v603_v37 = vadd.f32 %v602_v33, %v590_v31  ;;  %v616_v21 = vadd.f32 %v615_v28, %v613_v34 }
 0x245   :  { %v604_v38 = vrot.slane %v603_v37, 4  ;;  %v617_v18 = vadd.f32 %v616_v21, %v614_v35 }
 0x247   :  { %v605_v39 = vadd.f32 %v604_v38, %v603_v37  ;;  %v618_v30 = vrot.slane %v617_v18, 4 }
 0x249   :  { %v606_v41 = vrot.slane %v605_v39, 2  ;;  %v619_v29 = vadd.f32 %v618_v30, %v617_v18 }
 0x24b   :  { %v607_v42 = vadd.f32 %v606_v41, %v605_v39  ;;  %v620_v40 = vrot.slane %v619_v29, 2  ;;  %v731_v39 = vpop.permute.xlu0 %730 }
 0x24d   :  { %v608_v43 = vrot.slane %v607_v42, 1  ;;  %v621_v44 = vadd.f32 %v620_v40, %v619_v29 }
 0x24f   :  { %v609_v36 = vadd.f32 %v608_v43, %v607_v42  ;;  %v622_v45 = vrot.slane %v621_v44, 1 }
 0x251   :  { %v610_v47 = vmul.f32 0.03125, %v609_v36  ;;  %v623_v49 = vadd.f32 %v622_v45, %v621_v44 }
 0x253   :  { %v624_v51 = vmul.f32 0.03125, %v623_v49  ;;  %v625_v52 = vmul.f32 %v610_v47, %v610_v47  ;;  %v630_v54 = vsub.f32 %v575_v19, %v610_v47  ;;  %v631_v55 = vsub.f32 %v580_v16, %v610_v47 }
 0x254   :  { %v632_v56 = vsub.f32 %v585_v32, %v610_v47  ;;  %v633_v57 = vsub.f32 %v590_v31, %v610_v47  ;;  %v733_v32 = vlaneseq }
 0x255   :  { %v626_v58 = vsub.f32 %v624_v51, %v625_v52 }
 0x256   :  { %v734_v35 = vshrl.u32 %v733_v32, 7 }
 0x257   :  { %v627_v61 = vmax.f32 %v626_v58, 0.0 }
 0x258   :  { %v735_v38 = vsub.s32 0, %v734_v35 }
 0x259   :  { %v628_v0 = vadd.f32 1e-05, %v627_v61 }
 0x25a   :  { %v736_v41 = vrot.slane %v731_v39, %v735_v38 }
 0x25b   :  { %949 = vrsqrt.f32 %v628_v0 }
 0x265   :  { %v950_v48 = vpop.eup %949 }
 0x266   :  { %v634_v4 = vmul.f32 %v950_v48, %v630_v54  ;;  %v635_v5 = vmul.f32 %v950_v48, %v631_v55  ;;  %v636_v6 = vmul.f32 %v950_v48, %v632_v56  ;;  %v637_v7 = vmul.f32 %v950_v48, %v633_v57 }
 0x268   :  { %v658_v8 = vmul.f32 %v641_v46, %v634_v4  ;;  %v659_v9 = vmul.f32 %v646_v50, %v635_v5  ;;  %v660_v10 = vmul.f32 %v651_v59, %v636_v6  ;;  %v661_v11 = vmul.f32 %v656_v2, %v637_v7 }
 0x26a   :  { %v682_v63 = vadd.f32 %v665_v62, %v658_v8  ;;  %v683_v12 = vadd.f32 %v670_v1, %v659_v9  ;;  %v684_v13 = vadd.f32 %v675_v3, %v660_v10  ;;  %v685_v14 = vadd.f32 %v680_v53, %v661_v11 }
 0x26c   :  { %v686_v16 = vmax.f32 %v682_v63, 0.0  ;;  %v687_v17 = vmax.f32 %v683_v12, 0.0  ;;  %v688_v19 = vmax.f32 %v684_v13, 0.0  ;;  %v689_v20 = vmax.f32 %v685_v14, 0.0 }
 0x26e   :  { %v714_v22 = vmul.f32 %v697_v60, %v686_v16  ;;  %v715_v23 = vmul.f32 %v702_v15, %v687_v17  ;;  %v716_v25 = vmul.f32 %v707_v24, %v688_v19  ;;  %v717_v28 = vmul.f32 %v712_v27, %v689_v20 }
 0x270   :  { %v718_v26 = vadd.f32 %v715_v23, %v714_v22 }
 0x272   :  { %v719_v31 = vadd.f32 %v718_v26, %v716_v25 }
 0x274   :  { %v720_v33 = vadd.f32 %v719_v31, %v717_v28 }
 0x276   :  { %v721_v34 = vrot.slane %v720_v33, 4 }
 0x278   :  { %v722_v37 = vadd.f32 %v721_v34, %v720_v33 }
 0x27a   :  { %v723_v21 = vrot.slane %v722_v37, 2 }
 0x27c   :  { %v724_v18 = vadd.f32 %v723_v21, %v722_v37 }
 0x27e   :  { %v725_v30 = vrot.slane %v724_v18, 1 }
 0x280   :  { %v726_v29 = vadd.f32 %v725_v30, %v724_v18 }
 0x282   :  { %v737_v42 = vadd.f32 %v736_v41, %v726_v29 }
 0x284   :  { %v777_v40 = vmul.f32 -1.442695, %v737_v42 }
 0x286   :  { %951 = vpow2.f32 %v777_v40 }
 0x290   :  { %v952_v43 = vpop.eup %951 }
 0x291   :  { %v741_v44 = vadd.f32 1.0, %v952_v43 }
 0x293   :  { %953 = vrcp.f32 %v741_v44 }
 0x29d   :  { %v954_v36 = vpop.eup %953 }
 0x29e   :  { %744 = vst [vmem:[%s1323_s11] sm:$0x1] %v954_v36 }

</bundles_post_ra>
